<compile_context>
chip_gen: v5e
topology: v5e:2x2
jax: 0.10.0
libtpu: 0.0.40
codegen_flags: <defaults>
</compile_context>

<pallas_src>
import jax
import jax.numpy as jnp
from jax.experimental import pallas as pl
from jax.experimental.pallas import tpu as pltpu


def _cell_con_kernel(x_ref, w_ref, b_ref, o_ref):
    # x_ref: (C_in, bm)   activation tile, spatial on lanes (caller dtype)
    # w_ref: (C_out, C_in) bf16 pointwise conv weight with BN scale folded in
    # b_ref: (C_out, 1)    f32 folded BN bias
    x = jnp.maximum(x_ref[...], 0).astype(jnp.bfloat16)              # ReLU (VPU) + MXU dtype
    y = jnp.dot(w_ref[...], x, preferred_element_type=jnp.float32)   # MXU, (C_out, bm) f32
    o_ref[...] = (y + b_ref[...]).astype(o_ref.dtype)                # lane-dense store


def _round_up(x, m):
    return ((x + m - 1) // m) * m


def _pick_bm(M, C_in, C_out, x_dtype, out_dtype,
             budget_bytes=8 * 1024 * 1024, min_blocks=8):
    """Lane-aligned spatial tile: as big as the VMEM budget allows, but small enough that
    the spatial grid axis keeps >= min_blocks steps (v7x megacore + pipelining)."""
    def padded_col_bytes(c, dt):
        itemsize = jnp.dtype(dt).itemsize
        sublane = 8 * max(1, 4 // itemsize)      # (8,128) f32 tiles, (16,128) bf16 tiles
        return _round_up(max(int(c), 1), sublane) * itemsize

    # Double-buffered input + output columns, sublane-padded.
    per_col = 2 * (padded_col_bytes(C_in, x_dtype) + padded_col_bytes(C_out, out_dtype))
    bm = max(128, (budget_bytes // per_col) // 128 * 128)
    # Keep >= min_blocks spatial blocks so both v7x TensorCores and the DMA pipeline stay busy.
    bm = min(bm, max(128, _round_up(pl.cdiv(int(M), min_blocks), 128)))
    return int(M) if bm >= M else int(bm)


def _cell_con_forward(x, weight, gamma, beta, run_mean, run_var, stride, eps=1e-5):
    """ReLU -> Conv3d(1x1x1, stride, bias=False) -> BatchNorm3d(eval).  NCDHW in/out."""
    N, C_in, D, H, W = x.shape
    sd, sh, sw = stride
    C_out = weight.shape[0]

    # A 1x1x1 conv with stride s (padding 0) is a subsample + channel contraction; ReLU
    # commutes with the subsample, so it runs inside the kernel on the decimated data.
    # TODO(synk): fold this subsample into the kernel DMA to drop the extra HBM pass.
    if (sd, sh, sw) != (1, 1, 1):
        x = x[:, :, ::sd, ::sh, ::sw]
    Do, Ho, Wo = x.shape[2], x.shape[3], x.shape[4]
    M = Do * Ho * Wo
    xm = x.reshape(N, C_in, M)                    # contiguous -> free reshape

    # Fold eval-mode BatchNorm into the pointwise weight / per-channel bias.
    inv = gamma / jnp.sqrt(run_var + eps)
    w = (weight.reshape(C_out, C_in) * inv[:, None]).astype(jnp.bfloat16)   # (C_out, C_in)
    b = (beta - run_mean * inv).reshape(C_out, 1).astype(jnp.float32)       # (C_out, 1)

    out_dtype = x.dtype
    bm = _pick_bm(M, C_in, C_out, x.dtype, out_dtype)
    grid = (pl.cdiv(M, bm), N)                    # spatial blocks lead -> balanced 2-TC split

    x_bytes = jnp.dtype(x.dtype).itemsize
    o_bytes = jnp.dtype(out_dtype).itemsize
    cost = pl.CostEstimate(
        flops=2 * N * M * C_in * C_out,
        transcendentals=0,
        bytes_accessed=N * M * (C_in * x_bytes + C_out * o_bytes)
        + C_out * C_in * 2 + C_out * 4,
    )

    out = pl.pallas_call(
        _cell_con_kernel,
        out_shape=jax.ShapeDtypeStruct((N, C_out, M), out_dtype),
        grid_spec=pltpu.PrefetchScalarGridSpec(
            num_scalar_prefetch=0,
            grid=grid,
            in_specs=[
                pl.BlockSpec((None, C_in, bm), lambda j, n: (n, 0, j)),   # activations
                pl.BlockSpec((C_out, C_in), lambda j, n: (0, 0)),         # folded weight
                pl.BlockSpec((C_out, 1), lambda j, n: (0, 0)),            # folded bias
            ],
            out_specs=pl.BlockSpec((None, C_out, bm), lambda j, n: (n, 0, j)),
        ),
        compiler_params=pltpu.CompilerParams(
            dimension_semantics=("parallel", "parallel"),
            vmem_limit_bytes=32 * 1024 * 1024,
        ),
        cost_estimate=cost,
    )(xm, w, b)

    return out.reshape(N, C_out, Do, Ho, Wo)      # contiguous -> already NCDHW


cell_con_forward = jax.jit(_cell_con_forward, static_argnums=(6,))


def _reference(x, weight, gamma, beta, run_mean, run_var, stride, eps=1e-5):
    """Plain-JAX reference (f32): ReLU -> 1x1x1 strided conv -> BN (eval)."""
    sd, sh, sw = stride
    xr = jnp.maximum(x.astype(jnp.float32), 0.0)[:, :, ::sd, ::sh, ::sw]
    w = weight.reshape(weight.shape[0], weight.shape[1])
    y = jnp.einsum('ncdhw,oc->nodhw', xr, w)
    inv = gamma / jnp.sqrt(run_var + eps)
    return y * inv[None, :, None, None, None] + \
        (beta - run_mean * inv)[None, :, None, None, None]


if __name__ == "__main__":
    key = jax.random.PRNGKey(0)
    k_x, k_x2, k_w, k_g, k_b, k_m, k_v = jax.random.split(key, 7)

    N, C_in, C_out = 2, 4, 8
    weight = jax.random.normal(k_w, (C_out, C_in, 1, 1, 1), dtype=jnp.float32) * 0.1
    gamma = 1.0 + 0.1 * jax.random.normal(k_g, (C_out,), dtype=jnp.float32)
    beta = 0.1 * jax.random.normal(k_b, (C_out,), dtype=jnp.float32)
    run_mean = 0.1 * jax.random.normal(k_m, (C_out,), dtype=jnp.float32)
    run_var = jnp.abs(jax.random.normal(k_v, (C_out,), dtype=jnp.float32)) + 0.5

    def check(x, stride, tol):
        out = jax.block_until_ready(
            cell_con_forward(x, weight, gamma, beta, run_mean, run_var, stride))
        ref = _reference(x, weight, gamma, beta, run_mean, run_var, stride)
        assert out.shape == ref.shape, (out.shape, ref.shape)
        assert out.dtype == x.dtype, out.dtype
        err = float(jnp.max(jnp.abs(out.astype(jnp.float32) - ref)))
        assert err < tol, (stride, tuple(x.shape), err)

    # f32 activations; 128-aligned and ragged spatial extents; unit and mixed strides.
    x1 = jax.random.normal(k_x, (N, C_in, 8, 16, 16), dtype=jnp.float32)
    x2 = jax.random.normal(k_x2, (N, C_in, 6, 10, 14), dtype=jnp.float32)  # M % 128 != 0
    for x in (x1, x2):
        for stride in [(1, 1, 1), (2, 2, 2), (1, 2, 2)]:
            check(x, stride, tol=5e-2)           # bf16 MXU operands, f32 accumulation

    # bf16 activations/outputs: halves HBM bytes on this bandwidth-bound kernel.
    check(x1.astype(jnp.bfloat16), (2, 2, 2), tol=1e-1)

    print("KERNEL_OK")
</pallas_src>

<mosaic_0001>
module attributes {stable_mosaic.version = 11 : i64} {
  func.func @_cell_con_kernel(%arg0: i32, %arg1: i32, %arg2: memref<1x4x256xf32, #tpu.memory_space<vmem>>, %arg3: memref<8x4xbf16, #tpu.memory_space<vmem>>, %arg4: memref<8x1xf32, #tpu.memory_space<vmem>>, %arg5: memref<1x8x256xf32, #tpu.memory_space<vmem>>) attributes {dimension_semantics = [#tpu.dimension_semantics<parallel>, #tpu.dimension_semantics<parallel>], iteration_bounds = array<i64: 8, 2>, scalar_prefetch = 0 : i64, scratch_operands = 0 : i64, tpu.core_type = #tpu.core_type<tc>, window_params = [{transform_indices = @transform_0, window_bounds = array<i64: 1, 4, 256>}, {pipeline_mode = #tpu.pipeline_mode<synchronous>, transform_indices = @transform_1, window_bounds = array<i64: 8, 4>}, {pipeline_mode = #tpu.pipeline_mode<synchronous>, transform_indices = @transform_2, window_bounds = array<i64: 8, 1>}, {transform_indices = @transform_3, window_bounds = array<i64: 1, 8, 256>}]} {
    %c0 = arith.constant 0 : index
    %c0_0 = arith.constant 0 : index
    %c0_1 = arith.constant 0 : index
    %0 = vector.load %arg2[%c0, %c0_0, %c0_1] : memref<1x4x256xf32, #tpu.memory_space<vmem>>, vector<1x4x256xf32>
    %1 = vector.shape_cast %0 : vector<1x4x256xf32> to vector<4x256xf32>
    %cst = arith.constant 0.000000e+00 : f32
    %2 = vector.broadcast %cst : f32 to vector<4x256xf32>
    %3 = arith.maximumf %1, %2 : vector<4x256xf32>
    %4 = arith.truncf %3 : vector<4x256xf32> to vector<4x256xbf16>
    %c0_2 = arith.constant 0 : index
    %c0_3 = arith.constant 0 : index
    %5 = vector.load %arg3[%c0_2, %c0_3] : memref<8x4xbf16, #tpu.memory_space<vmem>>, vector<8x4xbf16>
    %cst_4 = arith.constant dense<0.000000e+00> : vector<8x256xf32>
    %6 = tpu.matmul %5, %4, %cst_4 {dimension_numbers = #tpu.dot_dimension_numbers<[1], [0], [0], [1], [0, 0, 1, 1], [], []>} : vector<8x4xbf16>, vector<4x256xbf16>, vector<8x256xf32> -> vector<8x256xf32>
    %c0_5 = arith.constant 0 : index
    %c0_6 = arith.constant 0 : index
    %7 = vector.load %arg4[%c0_5, %c0_6] : memref<8x1xf32, #tpu.memory_space<vmem>>, vector<8x1xf32>
    %8 = vector.broadcast %7 : vector<8x1xf32> to vector<8x256xf32>
    %9 = arith.addf %6, %8 : vector<8x256xf32>
    %c0_7 = arith.constant 0 : index
    %c0_8 = arith.constant 0 : index
    %c0_9 = arith.constant 0 : index
    %10 = vector.load %arg5[%c0_7, %c0_8, %c0_9] : memref<1x8x256xf32, #tpu.memory_space<vmem>>, vector<1x8x256xf32>
    %11 = vector.shape_cast %10 : vector<1x8x256xf32> to vector<8x256xf32>
    %12 = vector.shape_cast %9 : vector<8x256xf32> to vector<1x8x256xf32>
    tpu.vector_store %arg5[%c0_7, %c0_8, %c0_9], %12 {strides = array<i32>} : memref<1x8x256xf32, #tpu.memory_space<vmem>>, vector<1x8x256xf32>,
    return
  }
  func.func @transform_0(%arg0: i32, %arg1: i32) -> (i32, i32, i32) {
    %c0_i32 = arith.constant 0 : i32
    %c0_i32_0 = arith.constant 0 : i32
    return %arg1, %c0_i32, %arg0 : i32, i32, i32
  }
  func.func @transform_1(%arg0: i32, %arg1: i32) -> (i32, i32) {
    %c0_i32 = arith.constant 0 : i32
    %c0_i32_0 = arith.constant 0 : i32
    %c0_i32_1 = arith.constant 0 : i32
    return %c0_i32, %c0_i32_0 : i32, i32
  }
  func.func @transform_2(%arg0: i32, %arg1: i32) -> (i32, i32) {
    %c0_i32 = arith.constant 0 : i32
    %c0_i32_0 = arith.constant 0 : i32
    %c0_i32_1 = arith.constant 0 : i32
    return %c0_i32, %c0_i32_0 : i32, i32
  }
  func.func @transform_3(%arg0: i32, %arg1: i32) -> (i32, i32, i32) {
    %c0_i32 = arith.constant 0 : i32
    %c0_i32_0 = arith.constant 0 : i32
    return %arg1, %c0_i32, %arg0 : i32, i32, i32
  }
}

</mosaic_0001>

<bundles_post_ra>
// kernel: _cell_con_forward.1
= control target key start
LH: loop header
LB: loop body
LE: loop exit
PB: predicated region body
PF: predicated region fallthrough
CT: control target
= control target key end

     0   :  { %s475_s12 = smov 0   ;;  %s477_s13 = smov 0   ;;  %s532_s0 = inlined_call_operand.vmem [shape: f32[2,4,2048], index: 0, kind: input, shape index: {}]   ;;  %s533_s1 = inlined_call_operand.vmem [shape: bf16[8,4], index: 1, kind: input, shape index: {}]   ;;  %s534_s2 = inlined_call_operand.vmem [shape: f32[8,1], index: 2, kind: input, shape index: {}]   ;;  %s535_s3 = inlined_call_operand.vmem [shape: f32[2,8,2048], index: 3, kind: output, shape index: {}]  }
   0x1   :  { %s479_s14 = smov 0   ;;  %s481_s15 = smov 0  }
   0x2   :  { %s483_s16 = smov 0  }
   0x3 LB: > { %s22_s17 = sadd.s32 1, %s444_s14  ;;  %s25_s18 = sadd.s32 1, %s448_s15  ;;  %s452_s16 = sphi %s483_s16, %s13_s16   ;;  %s448_s15 = sphi %s481_s15, %s539_s15   ;;  %s444_s14 = sphi %s479_s14, %s538_s14   ;;  %s440_s13 = sphi %s477_s13, %s537_s13   ;;  %s436_s12 = sphi %s475_s12, %s536_s12  }
   0x4   : > { %p23_p0 = scmp.ge.s32.totalorder %s22_s17, 2  ;;  %p361_p1 = scmp.ge.s32.totalorder %s452_s16, 1 }
   0x5   : > { %p158_p2 = scmp.lt.s32.totalorder %s452_s16, 17 }
   0x6   : > { %s541_s17 = smov (%p23_p0, %s22_s17), 0  ;;  %s543_s18 = smov (!%p23_p0, %s25_s18), %s448_s15 }
   0x7   : > { %p159_p3 = pnand %p361_p1, %p158_p2  ;;  %p27_p4 = scmp.ge.s32.totalorder %s543_s18, 8 }
   0x8   : > { %s362_s19 = sshll.u32 (!%p159_p3), %s440_s13, 1  ;;  %p191_p5 = scmp.lt.s32.totalorder (!%p159_p3), %s436_s12, 1 }
   0x9   : > { %s545_s18 = smov (%p27_p4, %s543_s18), 0  ;;  %162 = sbr.rel (%p159_p3) target bundleno = 170 (0xaa), region = 32 }
   0xa   : > { %p193_p6 = scmp.lt.s32.totalorder (!%p159_p3), %s362_s19, 15 }
   0xe   : > { %v222_v0 = vld [vmem:[%s534_s2] sm:$0xff]  ;;  %s547_s12 = smov (!%p191_p5, %s436_s12), 1  ;;  %v454_v1 = vmov 0   ;;  %s549_s19 = smov (!%p193_p6, %s362_s19), 15  ;;  %vm232_vm0 = vcmask 1041408   ;;  %vm228_vm1 = vcmask 31744  }
   0xf   : > { %413 = vset.pattern.permute.xlu0 %v454_v1  ;;  %s363_s22 = sshll.u32 %s547_s12, 4  ;;  %v221_v10 = vld [vmem:[%s533_s1] sm:$0xf] }
  0x10   : > { %225 = vperm.xlu0 %413, %v222_v0   ;;  %s196_s23 = sadd.s32 %s363_s22, %s549_s19 }
  0x11   : > { %s364_s24 = sshll.u32 %s196_s23, 2  ;;  %s367_s30 = sshll.u32 %s196_s23, 3 }
  0x12   : > { %s198_s27 = scalar_lea.vmem %s532_s0, %s364_s24  ;;  %s208_s6 = scalar_lea.vmem %s535_s3, %s367_s30 }
  0x13   : > { %v211_v2 = vld [vmem:[%s198_s27] sm:$0xff] }
  0x14   : > { %v212_v3 = vmax.f32 %v211_v2, 0.0 }
  0x16   : > { %214 = vst [vmem:[#allocation1] ss:$2 sm:$0xff] %v212_v3 }
  0x1d   : > { %v215_v4 = vld.sshfl [vmem:[#allocation1] sm:$0xff pattern:$0x75316420]  ;;  %v216_v5 = vld.sshfl [vmem:[#allocation1 + $0x8] sm:$0xff pattern:$0x75316420] }
  0x1e   : > { %v219_v6 = vpack.c.bf16 %v215_v4, %v215_v4  ;;  %v220_v7 = vpack.c.bf16 %v216_v5, %v216_v5 }
  0x20   : > { %v234_v8 = vsel %vm232_vm0, %v219_v6, 0  ;;  %v237_v9 = vsel %vm232_vm0, %v220_v7, 0 }
  0x21   : > { %246 = vmatpush.bf16.msra.mxu0 %v234_v8  ;;  %259 = vmatpush.bf16.msra.mxu1 %v237_v9 }
  0x24   : > { %368 = vmatmul.msk.bf16.vlgmr.msra.gmra.mxu0 %vm228_vm1, %v221_v10  ;;  %369 = vmatmul.msk.bf16.vlgmr.msra.gmra.mxu1 %vm228_vm1, %v221_v10 }
  0x82   : > { %v226_v11 = vpop.permute.xlu0 %225 }
  0xa1   : > { %v248_v12 = vpop.f32.mrf.mxu0  ;;  %v261_v13 = vpop.f32.mrf.mxu1 }
  0xa2   : > { %v249_v14 = vadd.f32 %v248_v12, %v226_v11  ;;  %v262_v15 = vadd.f32 %v261_v13, %v226_v11 }
  0xa4   : > { %265 = vst [vmem:[%s208_s6] sm:$0xff] %v249_v14 }
  0xa5   : > { %266 = vst [vmem:[%s208_s6 + $0x8] sm:$0xff] %v262_v15 }
  0xa9   : > { %v250_v16 = vpop.f32.mrf.mxu0  ;;  %v263_v17 = vpop.f32.mrf.mxu1 }
  0xaa PF: > { %s13_s16 = sadd.s32 1, %s452_s16   ;;  %s536_s12 = smov %s444_s14 }
  0xab   : > { %p10_p7 = scmp.ge.s32.totalorder %s13_s16, 18   ;;  %s537_s13 = smov %s448_s15 }
  0xac   : > { %s538_s14 = smov %s541_s17  ;;  %s539_s15 = smov %s545_s18 }
  0xad   :  { %12 = sbr.rel (!%p10_p7) target bundleno = 3 (0x3), region = 62 }

</bundles_post_ra>
